<compile_context>
chip_gen: v7x
topology: tpu7x:2x2x1
jax: 0.10.0
libtpu: 0.0.40
codegen_flags: <defaults>
</compile_context>

<pallas_src>
import jax
import jax.numpy as jnp
from jax import lax
from jax.experimental import pallas as pl
from jax.experimental.pallas import tpu as pltpu


_H_CHUNK_BYTES = 2 << 20  # cap on the f32 hidden-activation tile (vreg/VMEM pressure)


def _ceil_to(x, q):
    return -(-x // q) * q


def _vmem_capacity_bytes():
    """Trace-time VMEM capacity; conservative 64 MiB (v7x per-TC) fallback."""
    try:
        info = pltpu.get_tpu_info()
        cap = getattr(info, "vmem_capacity_bytes", None)
        if cap:
            return int(cap)
    except Exception:
        pass
    return 64 << 20


def _plan_tiling(B, S, D, H, x_dtype, w_dtype):
    """Pick (block_b, b_pad, s_pad, chunk_h, vmem_limit_bytes)."""
    cap = _vmem_capacity_bytes()
    budget = int(cap * 0.70)                       # live-footprint target
    vmem_limit = min(int(cap * 0.80), 100 << 20)   # scoped VMEM limit

    x_item = jnp.dtype(x_dtype).itemsize
    w_item = jnp.dtype(w_dtype).itemsize
    quantum = 8 * max(1, 4 // x_item)              # 8 (f32) / 16 (bf16) sublane-dense
    b_pad = _ceil_to(B, quantum)
    s_pad = _ceil_to(S, 8)                         # keeps in-kernel reshapes free views

    def chunk_h_for(bt):
        full = bt * s_pad * H * 4
        if full <= _H_CHUNK_BYTES or H % 128 != 0:
            return H                               # single-shot linear1
        best = 128
        c = 128
        while c < H:
            if H % c == 0 and bt * s_pad * c * 4 <= _H_CHUNK_BYTES:
                best = c
            c += 128
        return best

    def footprint(bt):
        ch = chunk_h_for(bt)
        x_tile = 2 * bt * s_pad * D * x_item                 # double-buffered input
        outs = 2 * bt * (D * x_item + s_pad * 4)             # double-buffered outputs
        params = 2 * (D * H + 2 * H) * w_item                # double-buffered w1/b1/w2
        h_tmp = bt * s_pad * ch * 4                          # f32 hidden activations
        wsum_tmp = bt * s_pad * D * 4                        # f32 weighted-sum temp
        return x_tile + outs + params + h_tmp + wsum_tmp

    candidates = [b for b in range(quantum, b_pad + 1, quantum) if b_pad % b == 0]
    fitting = [b for b in candidates if footprint(b) <= budget]
    if not fitting:
        fitting = [candidates[0]]                            # best effort
    block_b = fitting[0]
    # Prefer >= 4 grid steps (2 per TC under megacore), then >= 2, then any.
    for min_steps in (4, 2, 1):
        ok = [b for b in fitting if b_pad // b >= min_steps]
        if ok:
            block_b = max(ok)
            break
    return block_b, b_pad, s_pad, chunk_h_for(block_b), vmem_limit


def _make_kernel(s_true, s_pad, h_total, chunk_h):
    def kernel(x_ref, w1_ref, b1_ref, w2_ref, pooled_ref, weights_ref):
        x = x_ref[...]                                 # (Bt, S_pad, D), native dtype
        bt, _, d = x.shape
        x2d = x.reshape(bt * s_pad, d)                 # free view (s_pad % 8 == 0)

        if chunk_h == h_total:
            # linear1 on the MXU (f32 accumulate), tanh on EUP, linear2 as a
            # broadcast-mul + lane reduce producing lane-dense (Bt, S_pad) scores.
            h = jnp.tanh(
                jnp.dot(x2d, w1_ref[...], preferred_element_type=jnp.float32)
                + b1_ref[...].astype(jnp.float32))
            scores = jnp.sum(
                h.reshape(bt, s_pad, h_total) * w2_ref[...].astype(jnp.float32),
                axis=-1)                               # (Bt, S_pad) f32
        else:
            # Large H: bound the f32 hidden-activation footprint by accumulating
            # the linear2 reduction over lane-aligned H chunks.
            n_chunks = h_total // chunk_h

            def body(c, acc):
                off = pl.multiple_of(c * chunk_h, chunk_h)
                b1c = b1_ref[:, pl.ds(off, chunk_h)].astype(jnp.float32)
                w2c = w2_ref[:, pl.ds(off, chunk_h)].astype(jnp.float32)
                hc = jnp.tanh(
                    jnp.dot(x2d, w1_ref[:, pl.ds(off, chunk_h)],
                            preferred_element_type=jnp.float32) + b1c)
                return acc + jnp.sum(hc.reshape(bt, s_pad, chunk_h) * w2c, axis=-1)

            scores = lax.fori_loop(0, n_chunks, body,
                                   jnp.zeros((bt, s_pad), jnp.float32),
                                   unroll=True)

        # Mask padded sequence positions (only emitted when S was padded).
        if s_pad != s_true:
            pos = lax.broadcasted_iota(jnp.int32, (bt, s_pad), 1)
            scores = jnp.where(pos < s_true, scores, jnp.float32(-1e30))

        # Softmax over the sequence axis (lane reduces).  b2 omitted: softmax is
        # shift-invariant, so the scalar bias cannot change the output.
        m = jnp.max(scores, axis=-1, keepdims=True)    # (Bt, 1)
        e = jnp.exp(scores - m)                        # (Bt, S_pad)
        l = jnp.sum(e, axis=-1, keepdims=True)         # (Bt, 1)
        r = pl.reciprocal(l, approx=True)              # EUP slot (otherwise idle)
        r = r * (2.0 - l * r)                          # one Newton step -> ~f32 accurate
        wgt = e * r                                    # (Bt, S_pad) f32

        # Weighted sum over S on the VPU; x is upcast lazily by the multiply
        # (f32 * native -> f32), no materialized f32 copy of the tile.
        pooled = jnp.sum(wgt[:, :, None] * x, axis=1)  # (Bt, D) f32

        pooled_ref[...] = pooled.astype(pooled_ref.dtype)
        weights_ref[...] = wgt.astype(weights_ref.dtype)

    return kernel


def attentive_pooling(x, w1, b1, w2, b2=None, *, block_b=None):
    """x: (B, S, D); w1: (D, H); b1: (H,); w2: (H, 1); b2: scalar (ignored:
    softmax shift-invariance makes it a mathematical no-op)."""
    del b2  # no-op under softmax; dropping it removes one DMA'd operand
    B, S, D = x.shape
    H = w1.shape[1]

    blk, b_pad, s_pad, chunk_h, vmem_limit = _plan_tiling(B, S, D, H, x.dtype, w1.dtype)
    if block_b is not None:
        blk = block_b
        assert b_pad % blk == 0, (b_pad, blk)

    x_in = x
    if (b_pad, s_pad) != (B, S):
        x_in = jnp.pad(x, ((0, b_pad - B), (0, s_pad - S), (0, 0)))

    b1_row = b1.reshape(1, H)   # keep native dtype; cast to f32 inside the kernel
    w2_row = w2.reshape(1, H)

    x_item = x.dtype.itemsize
    w_item = w1.dtype.itemsize
    flops = 2 * b_pad * s_pad * D * H + 2 * b_pad * s_pad * H + 2 * b_pad * s_pad * D
    transcendentals = b_pad * s_pad * (H + 1)
    bytes_accessed = (b_pad * s_pad * D * x_item            # x in
                      + (D * H + 2 * H) * w_item            # params
                      + b_pad * D * x_item                  # pooled out
                      + b_pad * s_pad * 4)                  # weights out (f32)

    kernel = _make_kernel(S, s_pad, H, chunk_h)
    grid = (b_pad // blk,)

    pooled_pad, weights_pad = pl.pallas_call(
        kernel,
        out_shape=(
            jax.ShapeDtypeStruct((b_pad, D), x.dtype),
            jax.ShapeDtypeStruct((b_pad, s_pad), jnp.float32),
        ),
        grid_spec=pltpu.PrefetchScalarGridSpec(
            num_scalar_prefetch=0,
            grid=grid,
            in_specs=[
                pl.BlockSpec((blk, s_pad, D), lambda i: (i, 0, 0)),   # x batch tile
                pl.BlockSpec((D, H), lambda i: (0, 0)),               # w1 (full)
                pl.BlockSpec((1, H), lambda i: (0, 0)),               # b1 row
                pl.BlockSpec((1, H), lambda i: (0, 0)),               # w2 row
            ],
            out_specs=[
                pl.BlockSpec((blk, D), lambda i: (i, 0)),             # pooled
                pl.BlockSpec((blk, s_pad), lambda i: (i, 0)),         # attn weights
            ],
        ),
        compiler_params=pltpu.CompilerParams(
            dimension_semantics=("parallel",),
            vmem_limit_bytes=vmem_limit,
        ),
        cost_estimate=pl.CostEstimate(
            flops=flops,
            transcendentals=transcendentals,
            bytes_accessed=bytes_accessed,
        ),
    )(x_in, w1, b1_row, w2_row)

    return pooled_pad[:B], weights_pad[:B, :S]


def reference(x, w1, b1, w2, b2):
    h = jnp.tanh(jnp.einsum("bsd,dh->bsh", x, w1) + b1)
    scores = jnp.einsum("bsh,ho->bso", h, w2) + b2           # (B, S, 1)
    weights = jax.nn.softmax(scores, axis=1)                 # (B, S, 1)
    pooled = jnp.einsum("bso,bsd->bod", weights, x)          # (B, 1, D)
    return pooled[:, 0, :], weights[:, :, 0]


if __name__ == "__main__":
    # Small shapes consistent with the module's forward: (batch, seq, feature).
    B, S, D, H = 16, 8, 32, 32

    key = jax.random.PRNGKey(0)
    kx, kw1, kb1, kw2, kb2 = jax.random.split(key, 5)

    x = jax.random.normal(kx, (B, S, D), dtype=jnp.float32)

    # Deterministic init mimicking nn.Linear's uniform(-1/sqrt(fan_in), ...)
    bound1 = 1.0 / jnp.sqrt(D)
    w1 = jax.random.uniform(kw1, (D, H), jnp.float32, -bound1, bound1)
    b1 = jax.random.uniform(kb1, (H,), jnp.float32, -bound1, bound1)
    bound2 = 1.0 / jnp.sqrt(H)
    w2 = jax.random.uniform(kw2, (H, 1), jnp.float32, -bound2, bound2)
    b2 = jax.random.uniform(kb2, (), jnp.float32, -bound2, bound2)

    pooled, weights = attentive_pooling(x, w1, b1, w2, b2)
    jax.block_until_ready((pooled, weights))

    ref_pooled, ref_weights = reference(x, w1, b1, w2, b2)
    assert pooled.shape == (B, D) and weights.shape == (B, S)
    # 1e-4 tolerance: approximate EUP reciprocal + one Newton step in the
    # softmax normalizer (everything else accumulates in f32).
    assert jnp.allclose(pooled, ref_pooled, atol=1e-4, rtol=1e-4)
    assert jnp.allclose(weights, ref_weights, atol=1e-4, rtol=1e-4)

    print("KERNEL_OK")
</pallas_src>

<mosaic_0001>
module attributes {stable_mosaic.version = 11 : i64} {
  func.func @kernel(%arg0: i32, %arg1: memref<8x8x32xf32, #tpu.memory_space<vmem>>, %arg2: memref<32x32xf32, #tpu.memory_space<vmem>>, %arg3: memref<1x32xf32, #tpu.memory_space<vmem>>, %arg4: memref<1x32xf32, #tpu.memory_space<vmem>>, %arg5: memref<8x32xf32, #tpu.memory_space<vmem>>, %arg6: memref<8x8xf32, #tpu.memory_space<vmem>>) attributes {dimension_semantics = [#tpu.dimension_semantics<parallel>], iteration_bounds = array<i64: 2>, scalar_prefetch = 0 : i64, scratch_operands = 0 : i64, tpu.core_type = #tpu.core_type<tc>, window_params = [{transform_indices = @transform_0, window_bounds = array<i64: 8, 8, 32>}, {pipeline_mode = #tpu.pipeline_mode<synchronous>, transform_indices = @transform_1, window_bounds = array<i64: 32, 32>}, {pipeline_mode = #tpu.pipeline_mode<synchronous>, transform_indices = @transform_2, window_bounds = array<i64: 1, 32>}, {pipeline_mode = #tpu.pipeline_mode<synchronous>, transform_indices = @transform_3, window_bounds = array<i64: 1, 32>}, {transform_indices = @transform_4, window_bounds = array<i64: 8, 32>}, {transform_indices = @transform_5, window_bounds = array<i64: 8, 8>}]} {
    %c0 = arith.constant 0 : index
    %c0_0 = arith.constant 0 : index
    %c0_1 = arith.constant 0 : index
    %0 = vector.load %arg1[%c0, %c0_0, %c0_1] : memref<8x8x32xf32, #tpu.memory_space<vmem>>, vector<8x8x32xf32>
    %1 = vector.shape_cast %0 : vector<8x8x32xf32> to vector<64x32xf32>
    %c0_2 = arith.constant 0 : index
    %c0_3 = arith.constant 0 : index
    %2 = vector.load %arg2[%c0_2, %c0_3] : memref<32x32xf32, #tpu.memory_space<vmem>>, vector<32x32xf32>
    %cst = arith.constant dense<0.000000e+00> : vector<64x32xf32>
    %3 = tpu.matmul %1, %2, %cst {dimension_numbers = #tpu.dot_dimension_numbers<[1], [0], [0], [1], [0, 0, 1, 1], [], []>} : vector<64x32xf32>, vector<32x32xf32>, vector<64x32xf32> -> vector<64x32xf32>
    %c0_4 = arith.constant 0 : index
    %c0_5 = arith.constant 0 : index
    %4 = vector.load %arg3[%c0_4, %c0_5] : memref<1x32xf32, #tpu.memory_space<vmem>>, vector<1x32xf32>
    %5 = vector.broadcast %4 : vector<1x32xf32> to vector<64x32xf32>
    %6 = arith.addf %3, %5 : vector<64x32xf32>
    %7 = math.tanh %6 : vector<64x32xf32>
    %8 = vector.shape_cast %7 : vector<64x32xf32> to vector<8x8x32xf32>
    %c0_6 = arith.constant 0 : index
    %c0_7 = arith.constant 0 : index
    %9 = vector.load %arg4[%c0_6, %c0_7] : memref<1x32xf32, #tpu.memory_space<vmem>>, vector<1x32xf32>
    %10 = vector.shape_cast %9 : vector<1x32xf32> to vector<1x1x32xf32>
    %11 = vector.broadcast %10 : vector<1x1x32xf32> to vector<8x8x32xf32>
    %12 = arith.mulf %8, %11 : vector<8x8x32xf32>
    %cst_8 = arith.constant dense<0.000000e+00> : vector<8x8xf32>
    %13 = vector.multi_reduction <add>, %12, %cst_8 [2] : vector<8x8x32xf32> to vector<8x8xf32>
    %cst_9 = arith.constant dense<0xFF800000> : vector<8xf32>
    %14 = vector.multi_reduction <maximumf>, %13, %cst_9 [1] : vector<8x8xf32> to vector<8xf32>
    %15 = vector.shape_cast %14 : vector<8xf32> to vector<8x1xf32>
    %16 = vector.broadcast %15 : vector<8x1xf32> to vector<8x8xf32>
    %17 = arith.subf %13, %16 : vector<8x8xf32>
    %18 = math.exp %17 : vector<8x8xf32>
    %cst_10 = arith.constant dense<0.000000e+00> : vector<8xf32>
    %19 = vector.multi_reduction <add>, %18, %cst_10 [1] : vector<8x8xf32> to vector<8xf32>
    %20 = vector.shape_cast %19 : vector<8xf32> to vector<8x1xf32>
    %21 = tpu.reciprocal %20 {approx = true} : vector<8x1xf32> -> vector<8x1xf32>
    %22 = arith.mulf %20, %21 : vector<8x1xf32>
    %cst_11 = arith.constant 2.000000e+00 : f32
    %23 = vector.broadcast %cst_11 : f32 to vector<8x1xf32>
    %24 = arith.subf %23, %22 : vector<8x1xf32>
    %25 = arith.mulf %21, %24 : vector<8x1xf32>
    %26 = vector.broadcast %25 : vector<8x1xf32> to vector<8x8xf32>
    %27 = arith.mulf %18, %26 : vector<8x8xf32>
    %28 = vector.shape_cast %27 : vector<8x8xf32> to vector<8x8x1xf32>
    %29 = vector.broadcast %28 : vector<8x8x1xf32> to vector<8x8x32xf32>
    %30 = arith.mulf %29, %0 : vector<8x8x32xf32>
    %cst_12 = arith.constant dense<0.000000e+00> : vector<8x32xf32>
    %31 = vector.multi_reduction <add>, %30, %cst_12 [1] : vector<8x8x32xf32> to vector<8x32xf32>
    %c0_13 = arith.constant 0 : index
    %c0_14 = arith.constant 0 : index
    %32 = vector.load %arg5[%c0_13, %c0_14] : memref<8x32xf32, #tpu.memory_space<vmem>>, vector<8x32xf32>
    tpu.vector_store %arg5[%c0_13, %c0_14], %31 {strides = array<i32>} : memref<8x32xf32, #tpu.memory_space<vmem>>, vector<8x32xf32>,
    %c0_15 = arith.constant 0 : index
    %c0_16 = arith.constant 0 : index
    %33 = vector.load %arg6[%c0_15, %c0_16] : memref<8x8xf32, #tpu.memory_space<vmem>>, vector<8x8xf32>
    tpu.vector_store %arg6[%c0_15, %c0_16], %27 {strides = array<i32>} : memref<8x8xf32, #tpu.memory_space<vmem>>, vector<8x8xf32>,
    return
  }
  func.func @transform_0(%arg0: i32) -> (i32, i32, i32) {
    %c0_i32 = arith.constant 0 : i32
    %c0_i32_0 = arith.constant 0 : i32
    %c0_i32_1 = arith.constant 0 : i32
    return %arg0, %c0_i32, %c0_i32_0 : i32, i32, i32
  }
  func.func @transform_1(%arg0: i32) -> (i32, i32) {
    %c0_i32 = arith.constant 0 : i32
    %c0_i32_0 = arith.constant 0 : i32
    %c0_i32_1 = arith.constant 0 : i32
    return %c0_i32, %c0_i32_0 : i32, i32
  }
  func.func @transform_2(%arg0: i32) -> (i32, i32) {
    %c0_i32 = arith.constant 0 : i32
    %c0_i32_0 = arith.constant 0 : i32
    %c0_i32_1 = arith.constant 0 : i32
    return %c0_i32, %c0_i32_0 : i32, i32
  }
  func.func @transform_3(%arg0: i32) -> (i32, i32) {
    %c0_i32 = arith.constant 0 : i32
    %c0_i32_0 = arith.constant 0 : i32
    %c0_i32_1 = arith.constant 0 : i32
    return %c0_i32, %c0_i32_0 : i32, i32
  }
  func.func @transform_4(%arg0: i32) -> (i32, i32) {
    %c0_i32 = arith.constant 0 : i32
    %c0_i32_0 = arith.constant 0 : i32
    return %arg0, %c0_i32 : i32, i32
  }
  func.func @transform_5(%arg0: i32) -> (i32, i32) {
    %c0_i32 = arith.constant 0 : i32
    %c0_i32_0 = arith.constant 0 : i32
    return %arg0, %c0_i32 : i32, i32
  }
}

</mosaic_0001>

<bundles_post_ra>
// kernel: tpu_custom_call.1
= control target key start
LH: loop header
LB: loop body
LE: loop exit
PB: predicated region body
PF: predicated region fallthrough
CT: control target
= control target key end

     0   :  { %11 = vsyncpa [#allocation3], 0  ;;  %s1727_s0 = inlined_call_operand.hbm [shape: f32[16,8,32], index: 0, kind: input, shape index: {}]   ;;  %s1728_s1 = inlined_call_operand.hbm [shape: f32[32,32], index: 1, kind: input, shape index: {}]   ;;  %s1729_s2 = inlined_call_operand.vmem [shape: f32[1,32], index: 2, kind: input, shape index: {}]   ;;  %s1730_s3 = inlined_call_operand.vmem [shape: f32[1,32], index: 3, kind: input, shape index: {}]   ;;  %s1731_s4 = inlined_call_operand.hbm [shape: f32[16,32], index: 4, kind: output, shape index: {0}]   ;;  %s1732_s5 = inlined_call_operand.vmem [shape: f32[16,8], index: 5, kind: output, shape index: {1}]  }
   0x1   :  { %13 = vsyncpa [#allocation3 + $0x1], 0 }
   0x2   :  { %14 = vsyncpa [#allocation6], 0 }
   0x3   :  { %15 = vsyncpa [#allocation4], 0 }
   0x4   :  { %17 = vsyncpa [#allocation4 + $0x1], 0  ;;  %s1340_s18 = smov 0   ;;  %s1342_s19 = smov 0  }
   0x5   :  { %s1344_s20 = smov 0   ;;  %s1346_s21 = smov 0  }
   0x6 LB: > { %s1361_s22 = sadd.s32 4294967295, %s1302_s21   ;;  %s1007_s23 = sadd.s32 4294967294, %s1302_s21   ;;  %s1302_s21 = sphi %s1346_s21, %s1752_s21   ;;  %s1298_s20 = sphi %s1344_s20, %s1751_s20   ;;  %s1294_s19 = sphi %s1342_s19, %s1750_s19   ;;  %s1290_s18 = sphi %s1340_s18, %s1749_s18  }
   0x7   : > { %p43_p0 = scmp.ne.s32.totalorder %s1294_s19, %s1290_s18  ;;  %p1733_p1 = scmp.eq.s32.totalorder %s1361_s22, 0 }
   0x8   : > { %p136_p3 = scmp.eq.s32.totalorder %s1007_s23, 1  ;;  %p1008_p5 = scmp.ge.s32.totalorder %s1302_s21, 1 }
   0x9   : > { %p1370_p4 = por %p1733_p1, %p43_p0  ;;  %p169_p7 = scmp.lt.s32.totalorder %s1302_s21, 3 }
   0xa   : > { %p1375_p6 = por %p136_p3, %p43_p0  ;;  %s1304_s27 = smov [#allocation5]  }
   0xb   : > { %s1736_s24 = scalar_select %p1370_p4, 1, 0 }
   0xc   : > { %s1737_s25 = scalar_select %p1375_p6, 1, 0 }
   0xd   : > { %p1380_p8 = pnand %p1008_p5, %p169_p7  ;;  %s181_s28 = sshll.u32 %s1304_s27, 4  ;;  %s1384_s28 = int_to_ptr.vmem [resolvable:$true] %s181_s28 }
   0xe   : > { %s1396_s30 = sadd.s32 1, %s1302_s21   ;;  %s30_s6 = sadd.s32 1, %s1298_s20 }
   0xf   : > { %s1738_s26 = scalar_select %p1380_p8, 1, 0 }
  0x10   : > { %p1086_p9 = pneg %p1380_p8  ;;  %s27_s7 = ssub.s32 %s1302_s21, %s1396_s30 }
  0x11   : > { %s1174_s10 = scalar_lea.hbm %s1728_s1, 512 }
  0x12   : > { %p1391_p11 = pnand %p1086_p9, %p1733_p1  ;;  %p1175_p12 = scmp.ne.s32.totalorder %s1728_s1, %s1174_s10 }
  0x13   : > { %p1181_p5 = scmp.lt.u32.totalorder %s1174_s10, %s1728_s1 }
  0x14   : > { %p1176_p13 = pneg %p1391_p11 }
  0x16   : > { %p1177_p0 = pnand %p1176_p13, %p1175_p12 }
  0x18   : > { %p1178_p3 = pneg %p1177_p0 }
  0x1a   : > { %p1183_p7 = pnand %p1181_p5, %p1178_p3 }
  0x1c   : > { %1186 = shalt.err (!%p1183_p7)
}
  0x1d   : > { %s1187_s15 = scalar_lea.vmem %s1384_s28, 512  ;;  %p1195_p2 = scmp.lt.s32.totalorder %s1384_s28, %s1384_s28 }
  0x1e   : > { %p1188_p9 = scmp.ne.s32.totalorder %s1384_s28, %s1187_s15  ;;  %p1196_p6 = scmp.lt.s32.totalorder %s1187_s15, %s1187_s15 }
  0x20   : > { %p1190_p10 = pnand %p1188_p9, %p1176_p13  ;;  %p1197_p4 = por %p1196_p6, %p1195_p2 }
  0x22   : > { %p1191_p1 = pneg %p1190_p10 }
  0x24   : > { %p1198_p8 = pnand %p1197_p4, %p1191_p1 }
  0x26   : > { %1201 = shalt.err (!%p1198_p8)
}
  0x27   : > { %s1305_s16 = smov 128   ;;  %s1306_s17 = smov 8  }
  0x28   : > { %1089 = dma.hbm_to_vmem [thread:$0]  (!%p1391_p11), %s1728_s1, 512, %s1384_s28, [#allocation6], %s1305_s16, %s1305_s16, %s1306_s17  }
  0x29   : > { %p28_p1 = scmp.eq.s32.totalorder %s27_s7, 0  ;;  %p37_p2 = scmp.ne.s32.totalorder %s1298_s20, %s1294_s19 }
  0x2a   : > { %p38_p4 = scmp.eq.s32.totalorder %s1302_s21, 0  ;;  %p1099_p6 = scmp.lt.s32.totalorder %s1302_s21, 2 }
  0x2b   : > { %s1430_s8 = scalar_select %p28_p1, %s1298_s20, %s30_s6  }
  0x2c   : > { %p39_p8 = por %p38_p4, %p37_p2  ;;  %p1740_p10 = scmp.eq.s32.totalorder %s1361_s22, 1 }
  0x2d   : > { %s201_s29 = sand.u32 1, %s1298_s20   ;;  %s1033_s10 = sshll.u32 %s1302_s21, 10 }
  0x2e   : > { %p1434_p12 = por %p1740_p10, %p37_p2  ;;  %s1011_s11 = sshll.u32 %s201_s29, 6 }
  0x2f   : > { %s1443_s14 = scalar_lea.hbm %s1727_s0, %s1033_s10  ;;  %s205_s28 = scalar_lea.vmem [#allocation2], %s1011_s11 }
  0x30   : > { %s212_s6 = sshll.u32 %s205_s28, 4  ;;  %p1445_p11 = pnand %p1099_p6, %p39_p8  ;;  %s1449_s6 = int_to_ptr.vmem [resolvable:$true] %s212_s6 }
  0x31   : > { %s1451_s15 = scalar_lea.sflag [#allocation3], %s201_s29  ;;  %s1202_s23 = scalar_lea.hbm %s1443_s14, 1024 }
  0x32   : > { %p1203_p13 = scmp.ne.s32.totalorder %s1443_s14, %s1202_s23  ;;  %p1204_p0 = pneg %p1445_p11 }
  0x33   : > { %s1207_s11 = scalar_lea.hbm %s1727_s0, 2048  ;;  %p1208_p7 = scmp.lt.u32.totalorder %s1443_s14, %s1727_s0 }
  0x34   : > { %p1205_p3 = pnand %p1204_p0, %p1203_p13  ;;  %p1209_p9 = scmp.lt.u32.totalorder %s1207_s11, %s1202_s23 }
  0x35   : > { %p1211_p2 = scmp.lt.u32.totalorder %s1202_s23, %s1443_s14 }
  0x36   : > { %p1206_p5 = pneg %p1205_p3  ;;  %p1210_p1 = por %p1209_p9, %p1208_p7 }
  0x38   : > { %p1212_p4 = por %p1211_p2, %p1210_p1 }
  0x3a   : > { %p1213_p6 = pnand %p1212_p4, %p1206_p5 }
  0x3c   : > { %1216 = shalt.err (!%p1213_p6)
}
  0x3d   : > { %s1217_s29 = scalar_lea.vmem %s1449_s6, 1024  ;;  %s1307_s28 = smov [#allocation2]  }
  0x3e   : > { %p1218_p8 = scmp.ne.s32.totalorder %s1449_s6, %s1217_s29  ;;  %s1222_s27 = sshll.u32 %s1307_s28, 4  ;;  %s1223_s27 = int_to_ptr.vmem [resolvable:$false] %s1222_s27 }
  0x3f   : > { %s1224_s10 = scalar_lea.vmem %s1223_s27, 2048  ;;  %p1225_p3 = scmp.lt.s32.totalorder %s1449_s6, %s1223_s27 }
  0x40   : > { %p1220_p10 = pnand %p1218_p8, %p1204_p0  ;;  %p1226_p7 = scmp.lt.s32.totalorder %s1224_s10, %s1217_s29 }
  0x42   : > { %p1221_p13 = pneg %p1220_p10  ;;  %p1227_p9 = por %p1226_p7, %p1225_p3 }
  0x44   : > { %p1228_p1 = pnand %p1227_p9, %p1221_p13 }
  0x46   : > { %1231 = shalt.err (!%p1228_p1)
}
  0x47   : > { %1093 = dma.hbm_to_vmem [thread:$0]  (!%p1445_p11), %s1443_s14, 1024, %s1449_s6, %s1451_s15, %s1305_s16, %s1305_s16, %s1306_s17  }
  0x48   : > { %p1743_p0 = scmp.ne.s32.totalorder %s1738_s26, 0 }
  0x49   : > { %s1485_s23 = sand.u32 (!%p1743_p0), 1, %s1294_s19   ;;  %p1744_p5 = scmp.ne.s32.totalorder (!%p1743_p0), %s1736_s24, 0 }
  0x4a   : > { %224 = sbr.rel (%p1743_p0) target bundleno = 1150 (0x47e), region = 36  ;;  %s1015_s11 = sshll.u32 (!%p1743_p0), %s1485_s23, 6 }
  0x4b   : > { %s227_s12 = scalar_lea.sflag (!%p1743_p0), [#allocation3], %s1485_s23  ;;  %s1489_s13 = scalar_lea.vmem (!%p1743_p0), [#allocation2], %s1015_s11 }
  0x51   : > { %1277 = dma.done.wait (%p1744_p5), %s227_s12, 1024  }
  0x52   : > { %1279 = vsyncadd (%p1744_p5), %s227_s12, 4294966272  ;;  %p1745_p11 = scmp.eq.s32.totalorder %s1361_s22, 0 }
  0x54   : > { %1281 = dma.done.wait (%p1745_p11), [#allocation6], 512   ;;  %p1746_p2 = pmov %p1745_p11 }
  0x55   : > { %vm289_vm0 = vcmask 261120   ;;  %v278_v0 = vld [vmem:[#allocation5] sm:$0xff]  ;;  %v279_v1 = vld [vmem:[#allocation5 + $0x8] sm:$0xff]  ;;  %v280_v2 = vld [vmem:[#allocation5 + $0x10] sm:$0xff]  ;;  %v474_v56 = vlaneseq  ;;  %vm508_vm1 = vcmask 1041409   ;;  %vm510_vm2 = vcmask 1042434  }
  0x56   : > { %1283 = vsyncadd (%p1746_p2), [#allocation6], 4294966784  ;;  %v1066_v3 = vpack.c.bf16 %v279_v1, %v278_v0  ;;  %v281_v4 = vld [vmem:[#allocation5 + $0x18] sm:$0xff]  ;;  %v1500_v5 = vld [vmem:[%s1489_s13] sm:$0xff]  ;;  %vm512_vm3 = vcmask 1043459   ;;  %vm514_vm4 = vcmask 1044484  }
  0x57   : > { %v1070_v6 = vpack.c.bf16 %v281_v4, %v280_v2  ;;  %1054 = vmatprep.mubr.msk.f32.mxu0 %vm289_vm0, %v1500_v5  ;;  %v1505_v7 = vld [vmem:[%s1489_s13 + $0x20] sm:$0xff]  ;;  %v1510_v8 = vld [vmem:[%s1489_s13 + $0x8] sm:$0xff]  ;;  %v1516_v10 = vld [vmem:[%s1489_s13 + $0x10] sm:$0xff]  ;;  %v475_v57 = vand.u32 127, %v474_v56  ;;  %v1553_v58 = vshrl.u32 %v474_v56, 7  ;;  %vm516_vm5 = vcmask 1045509  }
  0x58   : > { %1067 = vmatprep.subr.bf16.mxu0 %v1066_v3  ;;  %1074 = vmatprep.subr.bf16.mxu1 %v1066_v3  ;;  %v1513_v9 = vld [vmem:[%s1489_s13 + $0x28] sm:$0xff]  ;;  %v1519_v11 = vld [vmem:[%s1489_s13 + $0x30] sm:$0xff]  ;;  %v1528_v12 = vld [vmem:[%s1489_s13 + $0x18] sm:$0xff]  ;;  %vm518_vm6 = vcmask 1046534   ;;  %vm520_vm7 = vcmask 1047559   ;;  %vm523_vm8 = vcmask 64512  }
  0x59   : > { %1069 = vmatpush3.bf16.msra.mxu0 %v1066_v3  ;;  %1076 = vmatpush3.bf16.msra.mxu1 %v1066_v3  ;;  %v1533_v13 = vld [vmem:[%s1489_s13 + $0x38] sm:$0xff]  ;;  %v1019_v14 = vld [vmem:[%s1729_s2] ss:$0 sm:$0xff]  ;;  %v1556_v60 = vsub.s32 %v475_v57, %v1553_v58  ;;  %p266_p4 = scmp.lt.s32.totalorder %s1361_s22, 1  ;;  %s1017_s28 = sshll.u32 %s1485_s23, 3 }
  0x5a   : > { %1071 = vmatprep.subr.bf16.mxu0 %v1070_v6  ;;  %1075 = vmatprep.subr.bf16.mxu1 %v1070_v6  ;;  %v1028_v31 = vld [vmem:[%s1730_s3] ss:$0 sm:$0xff]  ;;  %s1030_s27 = sshll.u32 %s1361_s22, 7  ;;  %s258_s10 = scalar_lea.vmem [#allocation7], %s1017_s28 }
  0x5b   : > { %1060 = vmatprep.mubr.msk.f32.mxu1 %vm289_vm0, %v1505_v7  ;;  %s1646_s14 = scalar_select %p266_p4, %s1361_s22, 1 }
  0x5c   : > { %s900_s11 = sshll.u32 %s258_s10, 4  ;;  %s1681_s24 = scalar_lea.hbm %s1731_s4, %s1030_s27  ;;  %s1683_s11 = int_to_ptr.vmem [resolvable:$true] %s900_s11 }
  0x5d   : > { %1073 = vmatpush3.bf16.msra.mxu0 %v1070_v6  ;;  %1077 = vmatpush3.bf16.msra.mxu1 %v1070_v6  ;;  %s1018_s6 = sshll.u32 %s1646_s14, 3  ;;  %s883_s22 = scalar_lea.sflag [#allocation4], %s1485_s23 }
  0x5e   : > { %s269_s29 = scalar_lea.vmem %s1732_s5, %s1018_s6  ;;  %s1232_s26 = scalar_lea.vmem %s1683_s11, 128 }
  0x5f   : > { %p1233_p6 = scmp.ne.s32.totalorder %s1683_s11, %s1232_s26  ;;  %s1309_s16 = smov [#allocation7]  }
  0x60   : > { %1055 = vmatmul.mubr.msk.f32.vlgmr.msra.gmra.mrb[0].mxu0 %vm289_vm0, %v1510_v8  ;;  %1061 = vmatmul.mubr.msk.f32.vlgmr.msra.gmra.mrb[0].mxu1 %vm289_vm0, %v1513_v9  ;;  %s1236_s17 = sshll.u32 %s1309_s16, 4  ;;  %s1237_s17 = int_to_ptr.vmem [resolvable:$false] %s1236_s17 }
  0x61   : > { %1057 = vmatprep.mubr.msk.f32.mxu0 %vm289_vm0, %v1516_v10  ;;  %1063 = vmatprep.mubr.msk.f32.mxu1 %vm289_vm0, %v1519_v11  ;;  %p1234_p8 = pnand %p1233_p6, %p1434_p12  ;;  %s1238_s14 = scalar_lea.vmem %s1237_s17, 256 }
  0x62   : > { %p1239_p13 = scmp.lt.s32.totalorder %s1683_s11, %s1237_s17  ;;  %p1240_p3 = scmp.lt.s32.totalorder %s1238_s14, %s1232_s26 }
  0x63   : > { %p1235_p10 = pneg %p1234_p8 }
  0x64   : > { %1058 = vmatmul.mubr.msk.f32.gmra.mrb[2].mxu0 %vm289_vm0, %v1528_v12  ;;  %1064 = vmatmul.mubr.msk.f32.gmra.mrb[2].mxu1 %vm289_vm0, %v1533_v13  ;;  %p1241_p7 = por %p1240_p3, %p1239_p13 }
  0x66   : > { %p1242_p9 = pnand %p1241_p7, %p1235_p10 }
 0x133   : > { %v1056_v15 = vpop.f32.mrb[0].mxu0  ;;  %v1062_v16 = vpop.f32.mrb[0].mxu1 }
 0x134   : > { %v386_v17 = vadd.f32 %v1056_v15, %v1019_v14  ;;  %v380_v18 = vpop.f32.mrb[1].mxu0  ;;  %v400_v19 = vpop.f32.mrb[1].mxu1  ;;  %v406_v29 = vadd.f32 %v1062_v16, %v1019_v14 }
 0x135   : > { %v381_v20 = vadd.f32 %v1019_v14, %v380_v18  ;;  %v401_v21 = vadd.f32 %v1019_v14, %v400_v19 }
 0x136   : > { %1140 = vtanh.f32 %v386_v17 }
 0x137   : > { %1142 = vtanh.f32 %v381_v20  ;;  %v1059_v22 = vpop.f32.mrb[2].mxu0  ;;  %v1065_v23 = vpop.f32.mrb[2].mxu1 }
 0x138   : > { %v396_v24 = vadd.f32 %v1059_v22, %v1019_v14  ;;  %v390_v25 = vpop.f32.mrb[3].mxu0  ;;  %v410_v26 = vpop.f32.mrb[3].mxu1  ;;  %1144 = vtanh.f32 %v401_v21  ;;  %v416_v30 = vadd.f32 %v1065_v23, %v1019_v14 }
 0x139   : > { %v391_v27 = vadd.f32 %v1019_v14, %v390_v25  ;;  %v411_v28 = vadd.f32 %v1019_v14, %v410_v26 }
 0x13a   : > { %1146 = vtanh.f32 %v396_v24 }
 0x13b   : > { %1148 = vtanh.f32 %v391_v27 }
 0x13c   : > { %1150 = vtanh.f32 %v411_v28  ;;  %v1308_v28 = vmov 0  }
 0x13d   : > { %1152 = vtanh.f32 %v406_v29  ;;  %1139 = vset.pattern.permute.xlu0 %v1308_v28  ;;  %1138 = vset.pattern.permute.xlu1 %v1308_v28  ;;  %v530_v29 = vsub.s32 0, %v1553_v58 }
 0x13e   : > { %1154 = vtanh.f32 %v416_v30  ;;  %v534_v30 = vsub.s32 1, %v1553_v58 }
 0x140   : > { %v1141_v32 = vpop.eup %1140 }
 0x141   : > { %v1143_v33 = vpop.eup %1142  ;;  %v435_v34 = vmul.f32 %v1141_v32, %v1028_v31  ;;  %v542_v32 = vsub.s32 3, %v1553_v58 }
 0x142   : > { %v1145_v35 = vpop.eup %1144  ;;  %v434_v37 = vmul.f32 %v1143_v33, %v1028_v31 }
 0x143   : > { %v445_v36 = vsel %vm289_vm0, %v435_v34, 0.0  ;;  %v438_v41 = vmul.f32 %v1145_v35, %v1028_v31 }
 0x144   : > { %v1147_v38 = vpop.eup %1146  ;;  %446 = vadd.xlane.f32.xlu0 %v445_v36  ;;  %v442_v44 = vsel %vm289_vm0, %v434_v37, 0.0  ;;  %v546_v37 = vsub.s32 4, %v1553_v58 }
 0x145   : > { %v1149_v39 = vpop.eup %1148  ;;  %v437_v40 = vmul.f32 %v1147_v38, %v1028_v31  ;;  %v454_v47 = vsel %vm289_vm0, %v438_v41, 0.0 }
 0x146   : > { %v1151_v42 = vpop.eup %1150  ;;  %v436_v45 = vmul.f32 %v1149_v39, %v1028_v31 }
 0x147   : > { %v451_v43 = vsel %vm289_vm0, %v437_v40, 0.0  ;;  %v1153_v46 = vpop.eup %1152  ;;  %v440_v48 = vmul.f32 %v1151_v42, %v1028_v31 }
 0x148   : > { %452 = vadd.xlane.f32.xlu1 %v451_v43  ;;  %443 = vadd.xlane.f32.xlu0 %v442_v44  ;;  %v448_v49 = vsel %vm289_vm0, %v436_v45, 0.0  ;;  %v439_v50 = vmul.f32 %v1153_v46, %v1028_v31  ;;  %v1155_v51 = vpop.eup %1154  ;;  %v550_v44 = vsub.s32 5, %v1553_v58 }
 0x149   : > { %v460_v52 = vsel %vm289_vm0, %v440_v48, 0.0  ;;  %v441_v54 = vmul.f32 %v1155_v51, %v1028_v31  ;;  %v538_v31 = vsub.s32 2, %v1553_v58  ;;  %v554_v48 = vsub.s32 6, %v1553_v58 }
 0x14a   : > { %v457_v53 = vsel %vm289_vm0, %v439_v50, 0.0 }
 0x14b   : > { %v463_v55 = vsel %vm289_vm0, %v441_v54, 0.0 }
 0x14c   : > { %449 = vadd.xlane.f32.xlu1 %v448_v49  ;;  %455 = vadd.xlane.f32.xlu0 %v454_v47 }
 0x150   : > { %458 = vadd.xlane.f32.xlu1 %v457_v53  ;;  %461 = vadd.xlane.f32.xlu0 %v460_v52  ;;  %v558_v52 = vsub.s32 7, %v1553_v58 }
 0x154   : > { %464 = vadd.xlane.f32.xlu1 %v463_v55 }
 0x1d1   : > { %v447_v59 = vpop.xlane.xlu0 %446 }
 0x1d2   : > { %v483_v0 = vrot.slane %v447_v59, %v1556_v60 }
 0x1d5   : > { %v453_v61 = vpop.xlane.xlu1 %452  ;;  %v444_v62 = vpop.xlane.xlu0 %443 }
 0x1d6   : > { %v479_v63 = vrot.slane %v444_v62, %v1556_v60  ;;  %v491_v6 = vrot.slane %v453_v61, %v1556_v60 }
 0x1d8   : > { %v509_v14 = vsel %vm508_vm1, %v483_v0, %v479_v63 }
 0x1d9   : > { %v450_v1 = vpop.xlane.xlu1 %449  ;;  %v456_v2 = vpop.xlane.xlu0 %455 }
 0x1da   : > { %v487_v3 = vrot.slane %v450_v1, %v1556_v60  ;;  %v495_v4 = vrot.slane %v456_v2, %v1556_v60 }
 0x1dc   : > { %v511_v15 = vsel %vm510_vm2, %v487_v3, %v509_v14 }
 0x1dd   : > { %v513_v16 = vsel %vm512_vm3, %v491_v6, %v511_v15  ;;  %v459_v17 = vpop.xlane.xlu1 %458  ;;  %v462_v18 = vpop.xlane.xlu0 %461 }
 0x1de   : > { %v515_v19 = vsel %vm514_vm4, %v495_v4, %v513_v16  ;;  %v499_v20 = vrot.slane %v459_v17, %v1556_v60  ;;  %v503_v21 = vrot.slane %v462_v18, %v1556_v60 }
 0x1e0   : > { %v517_v22 = vsel %vm516_vm5, %v499_v20, %v515_v19 }
 0x1e1   : > { %v465_v23 = vpop.xlane.xlu1 %464  ;;  %v519_v25 = vsel %vm518_vm6, %v503_v21, %v517_v22 }
 0x1e2   : > { %v507_v24 = vrot.slane %v465_v23, %v1556_v60 }
 0x1e4   : > { %v521_v26 = vsel %vm520_vm7, %v507_v24, %v519_v25 }
 0x1e5   : > { %v524_v27 = vsel %vm523_vm8, %v521_v26, -inf }
 0x1e6   : > { %525 = vmax.xlane.f32.xlu0 %v524_v27 }
 0x273   : > { %v526_v33 = vpop.xlane.xlu0 %525 }
 0x274   : > { %v531_v34 = vrot.slane %v526_v33, %v530_v29  ;;  %v535_v35 = vrot.slane %v526_v33, %v534_v30  ;;  %v539_v36 = vrot.slane %v526_v33, %v538_v31  ;;  %v543_v38 = vrot.slane %v526_v33, %v542_v32 }
 0x275   : > { %v547_v45 = vrot.slane %v526_v33, %v546_v37  ;;  %v551_v49 = vrot.slane %v526_v33, %v550_v44  ;;  %v555_v53 = vrot.slane %v526_v33, %v554_v48 }
 0x276   : > { %v568_v39 = vsub.f32 %v444_v62, %v531_v34  ;;  %v569_v40 = vsub.f32 %v447_v59, %v535_v35  ;;  %v570_v41 = vsub.f32 %v450_v1, %v539_v36  ;;  %v571_v46 = vsub.f32 %v453_v61, %v543_v38 }
 0x277   : > { %v572_v50 = vsub.f32 %v456_v2, %v547_v45  ;;  %v573_v54 = vsub.f32 %v459_v17, %v551_v49  ;;  %v559_v59 = vrot.slane %v526_v33, %v558_v52  ;;  %v574_v61 = vsub.f32 %v462_v18, %v555_v53 }
 0x278   : > { %v576_v42 = vmul.f32 1.442695, %v568_v39  ;;  %v578_v43 = vmul.f32 1.442695, %v569_v40  ;;  %v580_v47 = vmul.f32 1.442695, %v570_v41 }
 0x279   : > { %v582_v51 = vmul.f32 1.442695, %v571_v46  ;;  %v584_v55 = vmul.f32 1.442695, %v572_v50  ;;  %v586_v62 = vmul.f32 1.442695, %v573_v54  ;;  %v575_v0 = vsub.f32 %v465_v23, %v559_v59 }
 0x27a   : > { %1156 = vpow2.f32 %v576_v42  ;;  %v588_v1 = vmul.f32 1.442695, %v574_v61 }
 0x27b   : > { %1158 = vpow2.f32 %v578_v43  ;;  %v590_v3 = vmul.f32 1.442695, %v575_v0 }
 0x27c   : > { %1160 = vpow2.f32 %v580_v47 }
 0x27d   : > { %1162 = vpow2.f32 %v582_v51 }
 0x27e   : > { %1164 = vpow2.f32 %v584_v55 }
 0x27f   : > { %1166 = vpow2.f32 %v586_v62 }
 0x280   : > { %1168 = vpow2.f32 %v588_v1 }
 0x281   : > { %1170 = vpow2.f32 %v590_v3 }
 0x284   : > { %v1157_v56 = vpop.eup %1156 }
 0x285   : > { %v1159_v57 = vpop.eup %1158  ;;  %601 = vperm.xlu1 %1138, %v1157_v56  }
 0x286   : > { %604 = vperm.xlu0 %1139, %v1159_v57   ;;  %v1161_v63 = vpop.eup %1160 }
 0x287   : > { %v1163_v2 = vpop.eup %1162 }
 0x288   : > { %v1165_v4 = vpop.eup %1164 }
 0x289   : > { %607 = vperm.xlu1 %1138, %v1161_v63   ;;  %v1167_v6 = vpop.eup %1166 }
 0x28a   : > { %v1169_v14 = vpop.eup %1168 }
 0x28b   : > { %v1171_v15 = vpop.eup %1170 }
 0x28d   : > { %610 = vperm.xlu1 %1138, %v1163_v2  }
 0x291   : > { %613 = vperm.xlu1 %1138, %v1165_v4  }
 0x295   : > { %616 = vperm.xlu1 %1138, %v1167_v6  }
 0x299   : > { %619 = vperm.xlu1 %1138, %v1169_v14  }
 0x29d   : > { %622 = vperm.xlu1 %1138, %v1171_v15  }
 0x304   : > { %v602_v16 = vpop.permute.xlu1 %601 }
 0x305   : > { %v605_v20 = vpop.permute.xlu0 %604  ;;  %v627_v23 = vrot.slane %v602_v16, %v1556_v60 }
 0x306   : > { %v631_v22 = vrot.slane %v605_v20, %v1556_v60 }
 0x308   : > { %v608_v17 = vpop.permute.xlu1 %607  ;;  %v656_v28 = vsel %vm508_vm1, %v631_v22, %v627_v23 }
 0x309   : > { %v635_v24 = vrot.slane %v608_v17, %v1556_v60 }
 0x30b   : > { %v657_v34 = vsel %vm510_vm2, %v635_v24, %v656_v28 }
 0x30c   : > { %v611_v18 = vpop.permute.xlu1 %610 }
 0x30d   : > { %v639_v25 = vrot.slane %v611_v18, %v1556_v60 }
 0x30f   : > { %v658_v36 = vsel %vm512_vm3, %v639_v25, %v657_v34 }
 0x310   : > { %v614_v19 = vpop.permute.xlu1 %613 }
 0x311   : > { %v643_v26 = vrot.slane %v614_v19, %v1556_v60 }
 0x313   : > { %v659_v38 = vsel %vm514_vm4, %v643_v26, %v658_v36 }
 0x314   : > { %v617_v21 = vpop.permute.xlu1 %616 }
 0x315   : > { %v647_v33 = vrot.slane %v617_v21, %v1556_v60 }
 0x317   : > { %v660_v40 = vsel %vm516_vm5, %v647_v33, %v659_v38 }
 0x318   : > { %v620_v27 = vpop.permute.xlu1 %619 }
 0x319   : > { %v651_v35 = vrot.slane %v620_v27, %v1556_v60 }
 0x31b   : > { %v661_v42 = vsel %vm518_vm6, %v651_v35, %v660_v40 }
 0x31c   : > { %v623_v39 = vpop.permute.xlu1 %622 }
 0x31d   : > { %v655_v41 = vrot.slane %v623_v39, %v1556_v60 }
 0x31f   : > { %v662_v43 = vsel %vm520_vm7, %v655_v41, %v661_v42 }
 0x320   : > { %v664_v45 = vsel %vm523_vm8, %v662_v43, 0.0 }
 0x321   : > { %665 = vadd.xlane.f32.xlu1 %v664_v45 }
 0x3ae   : > { %v666_v46 = vpop.xlane.xlu1 %665 }
 0x3af   : > { %1172 = vrcp.f32 %v666_v46 }
 0x3b9   : > { %v1173_v47 = vpop.eup %1172 }
 0x3ba   : > { %v668_v49 = vmul.f32 %v1173_v47, %v666_v46 }
 0x3bc   : > { %v669_v50 = vsub.f32 2.0, %v668_v49 }
 0x3be   : > { %v670_v51 = vmul.f32 %v1173_v47, %v669_v50 }
 0x3c0   : > { %v675_v53 = vrot.slane %v670_v51, %v530_v29  ;;  %v679_v55 = vrot.slane %v670_v51, %v534_v30  ;;  %v683_v61 = vrot.slane %v670_v51, %v538_v31  ;;  %v687_v0 = vrot.slane %v670_v51, %v542_v32 }
 0x3c1   : > { %v691_v3 = vrot.slane %v670_v51, %v546_v37  ;;  %v695_v30 = vrot.slane %v670_v51, %v550_v44  ;;  %v699_v31 = vrot.slane %v670_v51, %v554_v48  ;;  %v703_v32 = vrot.slane %v670_v51, %v558_v52 }
 0x3c2   : > { %v712_v54 = vmul.f32 %v1157_v56, %v675_v53  ;;  %v713_v59 = vmul.f32 %v1159_v57, %v679_v55  ;;  %v714_v62 = vmul.f32 %v1161_v63, %v683_v61  ;;  %v715_v1 = vmul.f32 %v1163_v2, %v687_v0 }
 0x3c3   : > { %v716_v29 = vmul.f32 %v1165_v4, %v691_v3  ;;  %v717_v56 = vmul.f32 %v1167_v6, %v695_v30  ;;  %v718_v57 = vmul.f32 %v1169_v14, %v699_v31  ;;  %v719_v63 = vmul.f32 %v1171_v15, %v703_v32 }
 0x3c4   : > { %722 = vperm.xlu0 %1139, %v712_v54  }
 0x3c8   : > { %727 = vperm.xlu0 %1139, %v713_v59  }
 0x3cc   : > { %732 = vperm.xlu0 %1139, %v714_v62  }
 0x3d0   : > { %737 = vperm.xlu0 %1139, %v715_v1  }
 0x3d4   : > { %742 = vperm.xlu0 %1139, %v716_v29  }
 0x3d8   : > { %747 = vperm.xlu0 %1139, %v717_v56  }
 0x3dc   : > { %752 = vperm.xlu0 %1139, %v718_v57  }
 0x3e0   : > { %757 = vperm.xlu0 %1139, %v719_v63  }
 0x443   : > { %v723_v2 = vpop.permute.xlu0 %722 }
 0x444   : > { %v760_v16 = vmul.f32 %v723_v2, %v1500_v5  ;;  %v844_v33 = vrot.slane %v723_v2, %v1556_v60 }
 0x446   : > { %v768_v14 = vsel %vm289_vm0, %v760_v16, 0.0 }
 0x447   : > { %v728_v37 = vpop.permute.xlu0 %727  ;;  %v769_v18 = vrot.slane %v768_v14, 4 }
 0x448   : > { %v761_v4 = vmul.f32 %v728_v37, %v1510_v8 }
 0x449   : > { %v770_v22 = vadd.f32 %v769_v18, %v768_v14 }
 0x44a   : > { %v775_v48 = vsel %vm289_vm0, %v761_v4, 0.0 }
 0x44b   : > { %v733_v44 = vpop.permute.xlu0 %732  ;;  %v776_v17 = vrot.slane %v775_v48, 4 }
 0x44c   : > { %v762_v6 = vmul.f32 %v733_v44, %v1516_v10  ;;  %v852_v35 = vrot.slane %v733_v44, %v1556_v60 }
 0x44d   : > { %v777_v10 = vadd.f32 %v776_v17, %v775_v48 }
 0x44e   : > { %v782_v58 = vsel %vm289_vm0, %v762_v6, 0.0 }
 0x44f   : > { %v738_v52 = vpop.permute.xlu0 %737  ;;  %v783_v19 = vrot.slane %v782_v58, 4  ;;  %v778_v34 = vrot.slane %v777_v10, 2 }
 0x450   : > { %v763_v15 = vmul.f32 %v738_v52, %v1528_v12  ;;  %v848_v12 = vrot.slane %v728_v37, %v1556_v60  ;;  %v856_v39 = vrot.slane %v738_v52, %v1556_v60 }
 0x451   : > { %v784_v23 = vadd.f32 %v783_v19, %v782_v58  ;;  %v779_v50 = vadd.f32 %v778_v34, %v777_v10 }
 0x452   : > { %v789_v8 = vsel %vm289_vm0, %v763_v15, 0.0  ;;  %v873_v45 = vsel %vm508_vm1, %v848_v12, %v844_v33 }
 0x453   : > { %v790_v20 = vrot.slane %v789_v8, 4  ;;  %v743_v5 = vpop.permute.xlu0 %742  ;;  %v785_v38 = vrot.slane %v784_v23, 2  ;;  %v874_v51 = vsel %vm510_vm2, %v852_v35, %v873_v45  ;;  %v780_v32 = vrot.slane %v779_v50, 1 }
 0x454   : > { %v764_v21 = vmul.f32 %v743_v5, %v1505_v7  ;;  %v771_v7 = vrot.slane %v770_v22, 2  ;;  %v860_v42 = vrot.slane %v743_v5, %v1556_v60  ;;  %v875_v61 = vsel %vm512_vm3, %v856_v39, %v874_v51 }
 0x455   : > { %v791_v25 = vadd.f32 %v790_v20, %v789_v8  ;;  %v786_v59 = vadd.f32 %v785_v38, %v784_v23  ;;  %v781_v52 = vadd.f32 %v780_v32, %v779_v50 }
 0x456   : > { %v796_v24 = vsel %vm289_vm0, %v764_v21, 0.0  ;;  %v772_v55 = vadd.f32 %v771_v7, %v770_v22  ;;  %v876_v1 = vsel %vm514_vm4, %v860_v42, %v875_v61 }
 0x457   : > { %v797_v26 = vrot.slane %v796_v24, 4  ;;  %v748_v27 = vpop.permute.xlu0 %747  ;;  %v792_v41 = vrot.slane %v791_v25, 2  ;;  %v787_v4 = vrot.slane %v786_v59, 1 }
 0x458   : > { %v765_v28 = vmul.f32 %v748_v27, %v1513_v9  ;;  %v864_v47 = vrot.slane %v748_v27, %v1556_v60  ;;  %v773_v6 = vrot.slane %v772_v55, 1 }
 0x459   : > { %v798_v36 = vadd.f32 %v797_v26, %v796_v24  ;;  %v793_v0 = vadd.f32 %v792_v41, %v791_v25  ;;  %v788_v18 = vadd.f32 %v787_v4, %v786_v59 }
 0x45a   : > { %v803_v40 = vsel %vm289_vm0, %v765_v28, 0.0  ;;  %v877_v56 = vsel %vm516_vm5, %v864_v47, %v876_v1  ;;  %v774_v19 = vadd.f32 %v773_v6, %v772_v55 }
 0x45b   : > { %v804_v43 = vrot.slane %v803_v40, 4  ;;  %v753_v9 = vpop.permute.xlu0 %752  ;;  %v799_v46 = vrot.slane %v798_v36, 2  ;;  %v794_v48 = vrot.slane %v793_v0, 1 }
 0x45c   : > { %v766_v49 = vmul.f32 %v753_v9, %v1519_v11  ;;  %v868_v54 = vrot.slane %v753_v9, %v1556_v60  ;;  %v832_v10 = vsel %vm508_vm1, %v781_v52, %v774_v19 }
 0x45d   : > { %v805_v53 = vadd.f32 %v804_v43, %v803_v40  ;;  %v800_v11 = vadd.f32 %v799_v46, %v798_v36  ;;  %v795_v8 = vadd.f32 %v794_v48, %v793_v0  ;;  %v833_v24 = vsel %vm510_vm2, %v788_v18, %v832_v10 }
 0x45e   : > { %v810_v62 = vsel %vm289_vm0, %v766_v49, 0.0  ;;  %v878_v37 = vsel %vm518_vm6, %v868_v54, %v877_v56 }
 0x45f   : > { %v806_v3 = vrot.slane %v805_v53, 2  ;;  %v811_v29 = vrot.slane %v810_v62, 4  ;;  %v758_v30 = vpop.permute.xlu0 %757  ;;  %v834_v26 = vsel %vm512_vm3, %v795_v8, %v833_v24 }
 0x460   : > { %v767_v31 = vmul.f32 %v758_v30, %v1533_v13  ;;  %v872_v57 = vrot.slane %v758_v30, %v1556_v60  ;;  %v801_v13 = vrot.slane %v800_v11, 1 }
 0x461   : > { %v807_v63 = vadd.f32 %v806_v3, %v805_v53  ;;  %v812_v2 = vadd.f32 %v811_v29, %v810_v62 }
 0x462   : > { %v817_v16 = vsel %vm289_vm0, %v767_v31, 0.0  ;;  %v879_v44 = vsel %vm520_vm7, %v872_v57, %v878_v37  ;;  %v802_v21 = vadd.f32 %v801_v13, %v800_v11 }
 0x463   : > { %v813_v14 = vrot.slane %v812_v2, 2  ;;  %v818_v58 = vrot.slane %v817_v16, 4  ;;  %881 = vst.msk [vmem:[%s269_s29] sm:$0xff] %vm523_vm8, %v879_v44  ;;  %v808_v60 = vrot.slane %v807_v63, 1 }
 0x464   : > { %v835_v12 = vsel %vm514_vm4, %v802_v21, %v834_v26 }
 0x465   : > { %v814_v15 = vadd.f32 %v813_v14, %v812_v2  ;;  %v819_v17 = vadd.f32 %v818_v58, %v817_v16  ;;  %v809_v22 = vadd.f32 %v808_v60, %v807_v63 }
 0x467   : > { %v815_v20 = vrot.slane %v814_v15, 1  ;;  %v820_v5 = vrot.slane %v819_v17, 2  ;;  %v836_v28 = vsel %vm516_vm5, %v809_v22, %v835_v12 }
 0x469   : > { %v821_v23 = vadd.f32 %v820_v5, %v819_v17  ;;  %v816_v25 = vadd.f32 %v815_v20, %v814_v15 }
 0x46b   : > { %v822_v27 = vrot.slane %v821_v23, 1  ;;  %v837_v34 = vsel %vm518_vm6, %v816_v25, %v836_v28 }
 0x46d   : > { %v823_v33 = vadd.f32 %v822_v27, %v821_v23 }
 0x46f   : > { %v838_v35 = vsel %vm520_vm7, %v823_v33, %v837_v34 }
 0x470   : > { %840 = vst.msk [vmem:[%s258_s10] sm:$0xff] %vm289_vm0, %v838_v35 }
 0x471   : > { %1245 = shalt.err (!%p1242_p9)
}
 0x472   : > { %s1246_s23 = scalar_lea.hbm %s1681_s24, 128  ;;  %s1250_s15 = scalar_lea.hbm %s1731_s4, 256 }
 0x473   : > { %p1247_p1 = scmp.ne.s32.totalorder %s1681_s24, %s1246_s23  ;;  %p1251_p11 = scmp.lt.u32.totalorder %s1681_s24, %s1731_s4 }
 0x474   : > { %p1252_p2 = scmp.lt.u32.totalorder %s1250_s15, %s1246_s23  ;;  %p1254_p6 = scmp.lt.u32.totalorder %s1246_s23, %s1681_s24 }
 0x475   : > { %p1248_p0 = pnand %p1247_p1, %p1434_p12 }
 0x476   : > { %p1253_p4 = por %p1252_p2, %p1251_p11 }
 0x477   : > { %p1249_p5 = pneg %p1248_p0 }
 0x478   : > { %p1255_p8 = por %p1254_p6, %p1253_p4 }
 0x47a   : > { %p1256_p10 = pnand %p1255_p8, %p1249_p5 }
 0x47c   : > { %1259 = shalt.err (!%p1256_p10)
}
 0x47d   : > { %1084 = dma.vmem_to_hbm [thread:$0]  (%p1434_p12), %s1683_s11, 128, %s1681_s24, %s883_s22  }
 0x47e PF: > { %s915_s27 = sand.u32 1, %s1290_s18   ;;  %p1747_p13 = scmp.ne.s32.totalorder %s1737_s25, 0 }
 0x47f   : > { %p1748_p3 = scmp.ge.s32.totalorder %s1302_s21, 2  ;;  %s916_s10 = scalar_lea.sflag [#allocation4], %s915_s27 }
 0x481   : > { %p1095_p7 = pnand %p1748_p3, %p1747_p13 }
 0x483   : > { %1285 = dma.done.wait (!%p1095_p7), %s916_s10, 128  }
 0x484   : > { %1287 = vsyncadd (!%p1095_p7), %s916_s10, 4294967168  ;;  %p20_p9 = scmp.ge.s32.totalorder %s1396_s30, 4   ;;  %s1749_s18 = smov %s1294_s19 }
 0x485   : > { %s1750_s19 = smov %s1298_s20  ;;  %s1751_s20 = smov %s1430_s8 }
 0x486   : > { %s1752_s21 = smov %s1396_s30  ;;  %22 = sbr.rel (!%p20_p9) target bundleno = 6 (0x6), region = 97 }
 0x48d   :  { %928 = vsyncpa [#allocation3], 1 }
 0x48e   :  { %930 = vsyncpa [#allocation3 + $0x1], 1 }
 0x48f   :  { %931 = vsyncpa [#allocation6], 1 }
 0x490   :  { %932 = vsyncpa [#allocation4], 1 }
 0x491   :  { %934 = vsyncpa [#allocation4 + $0x1], 1 }

</bundles_post_ra>
